<compile_context>
chip_gen: v7x
topology: tpu7x:2x2x1
jax: 0.10.0
libtpu: 0.0.40
codegen_flags: <defaults>
</compile_context>

<pallas_src>
import functools

import jax
import jax.numpy as jnp
from jax.experimental import pallas as pl
from jax.experimental.pallas import tpu as pltpu


def _round_up(x, m):
    return (x + m - 1) // m * m


# ---------------------------------------------------------------------------
# Fused path: one grid step == NB whole images (statistics + SE + multiply)
# ---------------------------------------------------------------------------
def _cca_fused_kernel(x_ref, w1_ref, b1_ref, w2_ref, b2_ref, o_ref, *, inv_hw):
    # x block: (NB, C, HWp); w1 (C, Cr); b1 (1, Cr); w2 (C, Cr); b2 (C, 1)
    x = x_ref[...].astype(jnp.float32)                      # (NB, C, HWp)

    # single-pass statistics (zero padding in HWp contributes nothing)
    s = jnp.sum(x, axis=-1, keepdims=True)                  # (NB, C, 1)
    ss = jnp.sum(x * x, axis=-1, keepdims=True)             # (NB, C, 1)
    mean = s * inv_hw
    var = jnp.maximum(ss * inv_hw - mean * mean, 0.0)
    y = jnp.sqrt(var) + mean                                 # std + avg, (NB, C, 1)

    # conv_du[0]: 1x1 conv C -> Cr, ReLU  (broadcast-mul + reduce; no tiny MXU matmul)
    h = jnp.sum(y * w1_ref[...], axis=1, keepdims=True) + b1_ref[...]   # (NB, 1, Cr)
    h = jnp.maximum(h, 0.0)

    # conv_du[2]: 1x1 conv Cr -> C, sigmoid
    z = jnp.sum(h * w2_ref[...], axis=2, keepdims=True) + b2_ref[...]   # (NB, C, 1)
    scale = 1.0 / (1.0 + jnp.exp(-z))

    o_ref[...] = (x * scale).astype(o_ref.dtype)


# ---------------------------------------------------------------------------
# Spatially tiled two-pass path: grid (N, 2, T)
#   phase 0: accumulate per-channel sum / sumsq over HW tiles
#   phase 1: compute channel scale once (t == 0), then stream x * scale
# ---------------------------------------------------------------------------
def _cca_tiled_kernel(x_ref, w1_ref, b1_ref, w2_ref, b2_ref, o_ref,
                      s_ref, ss_ref, scale_ref, *, inv_hw):
    p = pl.program_id(1)
    t = pl.program_id(2)
    x = x_ref[0].astype(jnp.float32)                         # (C, THW)

    @pl.when(p == 0)
    def _accumulate():
        @pl.when(t == 0)
        def _reset():
            s_ref[...] = jnp.zeros_like(s_ref)
            ss_ref[...] = jnp.zeros_like(ss_ref)
        s_ref[...] = s_ref[...] + jnp.sum(x, axis=1, keepdims=True)
        ss_ref[...] = ss_ref[...] + jnp.sum(x * x, axis=1, keepdims=True)

    @pl.when(p == 1)
    def _apply():
        @pl.when(t == 0)
        def _make_scale():
            mean = s_ref[...] * inv_hw                       # (C, 1)
            var = jnp.maximum(ss_ref[...] * inv_hw - mean * mean, 0.0)
            y = jnp.sqrt(var) + mean                         # (C, 1)
            h = jnp.sum(y * w1_ref[...], axis=0, keepdims=True) + b1_ref[...]  # (1, Cr)
            h = jnp.maximum(h, 0.0)
            z = jnp.sum(h * w2_ref[...], axis=1, keepdims=True) + b2_ref[...]  # (C, 1)
            scale_ref[...] = 1.0 / (1.0 + jnp.exp(-z))
        o_ref[0] = (x * scale_ref[...]).astype(o_ref.dtype)


# ---------------------------------------------------------------------------
# Wrapper
# ---------------------------------------------------------------------------
def cca_layer(x_nchw, w1_c_cr, b1, w2_c_cr, b2, *,
              images_per_block=None,
              block_target_bytes=4 << 20,
              max_fused_block_bytes=6 << 20,
              force_spatial_tiling=False,
              hw_tile=None):
    """CCALayer forward.

    x_nchw:   (N, C, H, W)
    w1_c_cr:  (C, Cr)  == torch conv_du[0].weight[:, :, 0, 0].T   (Cr = C // reduction)
    b1:       (Cr,)    == torch conv_du[0].bias
    w2_c_cr:  (C, Cr)  == torch conv_du[2].weight[:, :, 0, 0]
    b2:       (C,)     == torch conv_du[2].bias
    """
    N, C, H, W = x_nchw.shape
    HW = H * W
    Cr = w1_c_cr.shape[1]
    dtype = x_nchw.dtype
    itemsize = jnp.dtype(dtype).itemsize
    inv_hw = 1.0 / HW

    # lane-dense spatial axis: pad H*W up to a multiple of 128 (exact with sum/sumsq
    # statistics since we divide by the true H*W); pad is sliced off afterwards.
    HWp = _round_up(HW, 128)
    x3 = x_nchw.reshape(N, C, HW)                  # contiguous reshape, no transpose
    if HWp != HW:
        x3 = jnp.pad(x3, ((0, 0), (0, 0), (0, HWp - HW)))

    w1f = w1_c_cr.astype(jnp.float32)
    w2f = w2_c_cr.astype(jnp.float32)
    b1r = b1.reshape(1, Cr).astype(jnp.float32)
    b2c = b2.reshape(C, 1).astype(jnp.float32)

    per_image_bytes = C * HWp * itemsize
    use_tiled = force_spatial_tiling or (per_image_bytes > max_fused_block_bytes)

    flops = 7 * N * C * HW + 4 * N * C * Cr
    transcendentals = 2 * N * C                    # sqrt + sigmoid per (n, c)
    weight_bytes = 2 * C * Cr * 4 + (C + Cr) * 4

    if not use_tiled:
        # ---- fused, image-batched path ----
        if images_per_block is not None:
            nb = max(1, min(int(images_per_block), N))
        else:
            nb = max(1, min(N, block_target_bytes // max(per_image_bytes, 1)))
            if N > 1:                               # keep >=2 grid steps for pipelining
                nb = min(nb, (N + 1) // 2)
        n_pad = _round_up(N, nb)
        if n_pad != N:
            x3 = jnp.pad(x3, ((0, n_pad - N), (0, 0), (0, 0)))

        block_io = nb * per_image_bytes
        block_f32 = nb * C * HWp * 4
        vmem_limit = int(min(100 << 20,
                             max(32 << 20, 4 * block_io + 4 * block_f32 + (2 << 20))))
        cost = pl.CostEstimate(
            flops=flops, transcendentals=transcendentals,
            bytes_accessed=2 * N * C * HW * itemsize + weight_bytes)

        out3 = pl.pallas_call(
            functools.partial(_cca_fused_kernel, inv_hw=inv_hw),
            out_shape=jax.ShapeDtypeStruct((n_pad, C, HWp), dtype),
            grid=(n_pad // nb,),
            in_specs=[
                pl.BlockSpec((nb, C, HWp), lambda n: (n, 0, 0)),   # x (NB images/step)
                pl.BlockSpec((C, Cr), lambda n: (0, 0)),           # w1
                pl.BlockSpec((1, Cr), lambda n: (0, 0)),           # b1
                pl.BlockSpec((C, Cr), lambda n: (0, 0)),           # w2
                pl.BlockSpec((C, 1), lambda n: (0, 0)),            # b2
            ],
            out_specs=pl.BlockSpec((nb, C, HWp), lambda n: (n, 0, 0)),
            compiler_params=pltpu.CompilerParams(
                dimension_semantics=("parallel",),
                vmem_limit_bytes=vmem_limit,
            ),
            cost_estimate=cost,
        )(x3, w1f, b1r, w2f, b2c)
        out3 = out3[:N, :, :HW]
    else:
        # ---- spatially tiled two-pass path (large H*W / tight VMEM, e.g. v7x) ----
        if hw_tile is not None:
            thw = int(hw_tile)
        else:
            thw = max(128, ((2 << 20) // max(C * itemsize, 1) // 128) * 128)
        thw = min(thw, HWp)
        assert thw % 128 == 0, thw
        hw_t = _round_up(HWp, thw)
        if hw_t != HWp:
            x3 = jnp.pad(x3, ((0, 0), (0, 0), (0, hw_t - HWp)))
        n_tiles = hw_t // thw

        tile_io = C * thw * itemsize
        vmem_limit = int(min(64 << 20, max(32 << 20, 8 * tile_io + (2 << 20))))
        cost = pl.CostEstimate(
            flops=flops, transcendentals=transcendentals,
            bytes_accessed=3 * N * C * HW * itemsize + weight_bytes)

        out3 = pl.pallas_call(
            functools.partial(_cca_tiled_kernel, inv_hw=inv_hw),
            out_shape=jax.ShapeDtypeStruct((N, C, hw_t), dtype),
            grid=(N, 2, n_tiles),
            in_specs=[
                pl.BlockSpec((1, C, thw), lambda n, p, t: (n, 0, t)),
                pl.BlockSpec((C, Cr), lambda n, p, t: (0, 0)),
                pl.BlockSpec((1, Cr), lambda n, p, t: (0, 0)),
                pl.BlockSpec((C, Cr), lambda n, p, t: (0, 0)),
                pl.BlockSpec((C, 1), lambda n, p, t: (0, 0)),
            ],
            # phase 0 pins the (unwritten) output buffer to tile 0, so nothing is
            # written back to HBM until phase 1 has produced real data.
            out_specs=pl.BlockSpec((1, C, thw), lambda n, p, t: (n, 0, t * p)),
            scratch_shapes=[
                pltpu.VMEM((C, 1), jnp.float32),   # sum(x)
                pltpu.VMEM((C, 1), jnp.float32),   # sum(x*x)
                pltpu.VMEM((C, 1), jnp.float32),   # channel scale
            ],
            compiler_params=pltpu.CompilerParams(
                dimension_semantics=("parallel", "arbitrary", "arbitrary"),
                vmem_limit_bytes=vmem_limit,
            ),
            cost_estimate=cost,
        )(x3, w1f, b1r, w2f, b2c)
        out3 = out3[:, :, :HW]

    return out3.reshape(N, C, H, W)


# ---------------------------------------------------------------------------
# Pure-JAX reference (mirrors the PyTorch forward) for correctness checking
# ---------------------------------------------------------------------------
def cca_reference(x, w1_c_cr, b1, w2_c_cr, b2):
    N, C, H, W = x.shape
    mean = jnp.mean(x, axis=(2, 3), keepdims=True)
    var = jnp.mean((x - mean) ** 2, axis=(2, 3), keepdims=True)
    y = jnp.sqrt(var) + mean                        # (N, C, 1, 1)
    yv = y.reshape(N, C)
    h = jnp.maximum(yv @ w1_c_cr + b1, 0.0)         # (N, Cr)
    z = jax.nn.sigmoid(h @ w2_c_cr.T + b2)          # (N, C)
    return x * z.reshape(N, C, 1, 1)


if __name__ == "__main__":
    key = jax.random.PRNGKey(0)

    def make_inputs(k, N, C, Cr, H, W):
        k1, k2, k3, k4, k5 = jax.random.split(k, 5)
        x = jax.random.normal(k1, (N, C, H, W), jnp.float32)
        w1 = jax.random.normal(k2, (C, Cr), jnp.float32) * (1.0 / C ** 0.5)
        b1 = jax.random.normal(k3, (Cr,), jnp.float32) * 0.01
        w2 = jax.random.normal(k4, (C, Cr), jnp.float32) * (1.0 / Cr ** 0.5)
        b2 = jax.random.normal(k5, (C,), jnp.float32) * 0.01
        return x, w1, b1, w2, b2

    def check(out, ref, tag):
        assert out.shape == ref.shape, (tag, out.shape, ref.shape)
        assert bool(jnp.all(jnp.isfinite(out))), tag
        err = float(jnp.max(jnp.abs(out - ref)))
        assert bool(jnp.allclose(out, ref, atol=1e-4, rtol=1e-5)), (tag, err)

    keys = jax.random.split(key, 3)

    # 1) primary config (fused, batched path): N=2, C=64, reduction=16, 16x16
    x, w1, b1, w2, b2 = make_inputs(keys[0], 2, 64, 4, 16, 16)
    out = jax.jit(cca_layer)(x, w1, b1, w2, b2)
    jax.block_until_ready(out)
    check(out, cca_reference(x, w1, b1, w2, b2), "fused")

    # 2) fused path with non-x128 spatial size (HW padding) + batch padding (N=3, NB=2)
    x, w1, b1, w2, b2 = make_inputs(keys[1], 3, 32, 4, 10, 10)
    fwd = jax.jit(functools.partial(cca_layer, images_per_block=2))
    out = fwd(x, w1, b1, w2, b2)
    jax.block_until_ready(out)
    check(out, cca_reference(x, w1, b1, w2, b2), "fused_padded")

    # 3) spatially tiled two-pass path (forced small tiles, as used for huge H*W / v7x)
    x, w1, b1, w2, b2 = make_inputs(keys[2], 1, 64, 4, 32, 32)
    fwd = jax.jit(functools.partial(cca_layer, force_spatial_tiling=True, hw_tile=256))
    out = fwd(x, w1, b1, w2, b2)
    jax.block_until_ready(out)
    check(out, cca_reference(x, w1, b1, w2, b2), "tiled")

    print("KERNEL_OK")
</pallas_src>

<mosaic_0001>
module attributes {stable_mosaic.version = 11 : i64} {
  func.func @_cca_fused_kernel(%arg0: i32, %arg1: memref<1x64x256xf32, #tpu.memory_space<vmem>>, %arg2: memref<64x4xf32, #tpu.memory_space<vmem>>, %arg3: memref<1x4xf32, #tpu.memory_space<vmem>>, %arg4: memref<64x4xf32, #tpu.memory_space<vmem>>, %arg5: memref<64x1xf32, #tpu.memory_space<vmem>>, %arg6: memref<1x64x256xf32, #tpu.memory_space<vmem>>) attributes {dimension_semantics = [#tpu.dimension_semantics<parallel>], iteration_bounds = array<i64: 2>, scalar_prefetch = 0 : i64, scratch_operands = 0 : i64, tpu.core_type = #tpu.core_type<tc>, window_params = [{transform_indices = @transform_0, window_bounds = array<i64: 1, 64, 256>}, {pipeline_mode = #tpu.pipeline_mode<synchronous>, transform_indices = @transform_1, window_bounds = array<i64: 64, 4>}, {pipeline_mode = #tpu.pipeline_mode<synchronous>, transform_indices = @transform_2, window_bounds = array<i64: 1, 4>}, {pipeline_mode = #tpu.pipeline_mode<synchronous>, transform_indices = @transform_3, window_bounds = array<i64: 64, 4>}, {pipeline_mode = #tpu.pipeline_mode<synchronous>, transform_indices = @transform_4, window_bounds = array<i64: 64, 1>}, {transform_indices = @transform_5, window_bounds = array<i64: 1, 64, 256>}]} {
    %c0 = arith.constant 0 : index
    %c0_0 = arith.constant 0 : index
    %c0_1 = arith.constant 0 : index
    %0 = vector.load %arg1[%c0, %c0_0, %c0_1] : memref<1x64x256xf32, #tpu.memory_space<vmem>>, vector<1x64x256xf32>
    %cst = arith.constant dense<0.000000e+00> : vector<1x64xf32>
    %1 = vector.multi_reduction <add>, %0, %cst [2] : vector<1x64x256xf32> to vector<1x64xf32>
    %2 = vector.shape_cast %1 : vector<1x64xf32> to vector<1x64x1xf32>
    %3 = arith.mulf %0, %0 : vector<1x64x256xf32>
    %cst_2 = arith.constant dense<0.000000e+00> : vector<1x64xf32>
    %4 = vector.multi_reduction <add>, %3, %cst_2 [2] : vector<1x64x256xf32> to vector<1x64xf32>
    %5 = vector.shape_cast %4 : vector<1x64xf32> to vector<1x64x1xf32>
    %cst_3 = arith.constant 3.906250e-03 : f32
    %6 = vector.broadcast %cst_3 : f32 to vector<1x64x1xf32>
    %7 = arith.mulf %2, %6 : vector<1x64x1xf32>
    %cst_4 = arith.constant 3.906250e-03 : f32
    %8 = vector.broadcast %cst_4 : f32 to vector<1x64x1xf32>
    %9 = arith.mulf %5, %8 : vector<1x64x1xf32>
    %10 = arith.mulf %7, %7 : vector<1x64x1xf32>
    %11 = arith.subf %9, %10 : vector<1x64x1xf32>
    %cst_5 = arith.constant 0.000000e+00 : f32
    %12 = vector.broadcast %cst_5 : f32 to vector<1x64x1xf32>
    %13 = arith.maximumf %11, %12 : vector<1x64x1xf32>
    %14 = math.sqrt %13 : vector<1x64x1xf32>
    %15 = arith.addf %14, %7 : vector<1x64x1xf32>
    %c0_6 = arith.constant 0 : index
    %c0_7 = arith.constant 0 : index
    %16 = vector.load %arg2[%c0_6, %c0_7] : memref<64x4xf32, #tpu.memory_space<vmem>>, vector<64x4xf32>
    %17 = vector.shape_cast %16 : vector<64x4xf32> to vector<1x64x4xf32>
    %18 = vector.broadcast %15 : vector<1x64x1xf32> to vector<1x64x4xf32>
    %19 = arith.mulf %18, %17 : vector<1x64x4xf32>
    %cst_8 = arith.constant dense<0.000000e+00> : vector<1x4xf32>
    %20 = vector.multi_reduction <add>, %19, %cst_8 [1] : vector<1x64x4xf32> to vector<1x4xf32>
    %21 = vector.shape_cast %20 : vector<1x4xf32> to vector<1x1x4xf32>
    %c0_9 = arith.constant 0 : index
    %c0_10 = arith.constant 0 : index
    %22 = vector.load %arg3[%c0_9, %c0_10] : memref<1x4xf32, #tpu.memory_space<vmem>>, vector<1x4xf32>
    %23 = vector.shape_cast %22 : vector<1x4xf32> to vector<1x1x4xf32>
    %24 = arith.addf %21, %23 : vector<1x1x4xf32>
    %cst_11 = arith.constant 0.000000e+00 : f32
    %25 = vector.broadcast %cst_11 : f32 to vector<1x1x4xf32>
    %26 = arith.maximumf %24, %25 : vector<1x1x4xf32>
    %c0_12 = arith.constant 0 : index
    %c0_13 = arith.constant 0 : index
    %27 = vector.load %arg4[%c0_12, %c0_13] : memref<64x4xf32, #tpu.memory_space<vmem>>, vector<64x4xf32>
    %28 = vector.shape_cast %27 : vector<64x4xf32> to vector<1x64x4xf32>
    %29 = vector.broadcast %26 : vector<1x1x4xf32> to vector<1x64x4xf32>
    %30 = arith.mulf %29, %28 : vector<1x64x4xf32>
    %cst_14 = arith.constant dense<0.000000e+00> : vector<1x64xf32>
    %31 = vector.multi_reduction <add>, %30, %cst_14 [2] : vector<1x64x4xf32> to vector<1x64xf32>
    %32 = vector.shape_cast %31 : vector<1x64xf32> to vector<1x64x1xf32>
    %c0_15 = arith.constant 0 : index
    %c0_16 = arith.constant 0 : index
    %33 = vector.load %arg5[%c0_15, %c0_16] : memref<64x1xf32, #tpu.memory_space<vmem>>, vector<64x1xf32>
    %34 = vector.shape_cast %33 : vector<64x1xf32> to vector<1x64x1xf32>
    %35 = arith.addf %32, %34 : vector<1x64x1xf32>
    %cst_17 = arith.constant 0.000000e+00 : f32
    %36 = vector.broadcast %cst_17 : f32 to vector<1x64x1xf32>
    %37 = arith.subf %36, %35 : vector<1x64x1xf32>
    %38 = math.exp %37 : vector<1x64x1xf32>
    %cst_18 = arith.constant 1.000000e+00 : f32
    %39 = vector.broadcast %cst_18 : f32 to vector<1x64x1xf32>
    %40 = arith.addf %39, %38 : vector<1x64x1xf32>
    %cst_19 = arith.constant 1.000000e+00 : f32
    %41 = vector.broadcast %cst_19 : f32 to vector<1x64x1xf32>
    %42 = arith.divf %41, %40 : vector<1x64x1xf32>
    %43 = vector.broadcast %42 : vector<1x64x1xf32> to vector<1x64x256xf32>
    %44 = arith.mulf %0, %43 : vector<1x64x256xf32>
    %c0_20 = arith.constant 0 : index
    %c0_21 = arith.constant 0 : index
    %c0_22 = arith.constant 0 : index
    %45 = vector.load %arg6[%c0_20, %c0_21, %c0_22] : memref<1x64x256xf32, #tpu.memory_space<vmem>>, vector<1x64x256xf32>
    tpu.vector_store %arg6[%c0_20, %c0_21, %c0_22], %44 {strides = array<i32>} : memref<1x64x256xf32, #tpu.memory_space<vmem>>, vector<1x64x256xf32>,
    return
  }
  func.func @transform_0(%arg0: i32) -> (i32, i32, i32) {
    %c0_i32 = arith.constant 0 : i32
    %c0_i32_0 = arith.constant 0 : i32
    %c0_i32_1 = arith.constant 0 : i32
    return %arg0, %c0_i32, %c0_i32_0 : i32, i32, i32
  }
  func.func @transform_1(%arg0: i32) -> (i32, i32) {
    %c0_i32 = arith.constant 0 : i32
    %c0_i32_0 = arith.constant 0 : i32
    %c0_i32_1 = arith.constant 0 : i32
    return %c0_i32, %c0_i32_0 : i32, i32
  }
  func.func @transform_2(%arg0: i32) -> (i32, i32) {
    %c0_i32 = arith.constant 0 : i32
    %c0_i32_0 = arith.constant 0 : i32
    %c0_i32_1 = arith.constant 0 : i32
    return %c0_i32, %c0_i32_0 : i32, i32
  }
  func.func @transform_3(%arg0: i32) -> (i32, i32) {
    %c0_i32 = arith.constant 0 : i32
    %c0_i32_0 = arith.constant 0 : i32
    %c0_i32_1 = arith.constant 0 : i32
    return %c0_i32, %c0_i32_0 : i32, i32
  }
  func.func @transform_4(%arg0: i32) -> (i32, i32) {
    %c0_i32 = arith.constant 0 : i32
    %c0_i32_0 = arith.constant 0 : i32
    %c0_i32_1 = arith.constant 0 : i32
    return %c0_i32, %c0_i32_0 : i32, i32
  }
  func.func @transform_5(%arg0: i32) -> (i32, i32, i32) {
    %c0_i32 = arith.constant 0 : i32
    %c0_i32_0 = arith.constant 0 : i32
    %c0_i32_1 = arith.constant 0 : i32
    return %arg0, %c0_i32, %c0_i32_0 : i32, i32, i32
  }
}

</mosaic_0001>

<bundles_post_ra>
// kernel: cca_layer.1
= control target key start
LH: loop header
LB: loop body
LE: loop exit
PB: predicated region body
PF: predicated region fallthrough
CT: control target
= control target key end

     0   :  { %s796_s18 = smov 0   ;;  %s1117_s0 = inlined_call_operand.vmem [shape: f32[2,64,256], index: 0, kind: input, shape index: {}]   ;;  %s1118_s1 = inlined_call_operand.vmem [shape: f32[64,4], index: 1, kind: input, shape index: {}]   ;;  %s1119_s2 = inlined_call_operand.vmem [shape: f32[1,4], index: 2, kind: input, shape index: {}]   ;;  %s1120_s3 = inlined_call_operand.vmem [shape: f32[64,4], index: 3, kind: input, shape index: {}]   ;;  %s1121_s4 = inlined_call_operand.vmem [shape: f32[64,1], index: 4, kind: input, shape index: {}]   ;;  %s1122_s5 = inlined_call_operand.vmem [shape: f32[2,64,256], index: 5, kind: output, shape index: {}]  }
   0x1 LB: > { %s685_s19 = sadd.s32 4294967295, %s763_s18   ;;  %p689_p0 = scmp.ge.s32.totalorder %s763_s18, 1  ;;  %s763_s18 = sphi %s796_s18, %s15_s18  }
   0x2   : > { %p187_p1 = scmp.lt.s32.totalorder %s763_s18, 3 }
   0x4   : > { %p188_p2 = pnand %p689_p0, %p187_p1 }
   0x5   : > { %p215_p3 = scmp.lt.s32.totalorder (!%p188_p2), %s685_s19, 1  ;;  %vm425_vm10 = vcmask (!%p188_p2), 31744  }
   0x6   : > { %191 = sbr.rel (%p188_p2) target bundleno = 569 (0x239), region = 40 }
   0xd   : > { %s1124_s19 = smov (!%p215_p3, %s685_s19), 1 }
   0xe   : > { %s696_s20 = sshll.u32 %s1124_s19, 7 }
   0xf   : > { %s812_s23 = scalar_lea.vmem %s1117_s0, %s696_s20  ;;  %s1080_s7 = scalar_lea.vmem %s1122_s5, %s696_s20 }
  0x10   : > { %v815_v0 = vld [vmem:[%s812_s23 + $0x20] sm:$0xff]  ;;  %v818_v1 = vld [vmem:[%s812_s23 + $0x28] sm:$0xff]  ;;  %v829_v5 = vld [vmem:[%s812_s23 + $0x30] sm:$0xff] }
  0x11   : > { %v821_v2 = vld [vmem:[%s812_s23] sm:$0xff]  ;;  %v247_v3 = vadd.f32 %v818_v1, %v815_v0  ;;  %v826_v4 = vld [vmem:[%s812_s23 + $0x8] sm:$0xff]  ;;  %v832_v6 = vld [vmem:[%s812_s23 + $0x38] sm:$0xff]  ;;  %v269_v20 = vmul.f32 %v815_v0, %v815_v0  ;;  %v270_v21 = vmul.f32 %v818_v1, %v818_v1  ;;  %v271_v26 = vmul.f32 %v829_v5, %v829_v5 }
  0x12   : > { %v241_v7 = vadd.f32 %v826_v4, %v821_v2  ;;  %v837_v8 = vld [vmem:[%s812_s23 + $0x10] sm:$0xff]  ;;  %v840_v9 = vld [vmem:[%s812_s23 + $0x18] sm:$0xff]  ;;  %v250_v10 = vadd.f32 %v832_v6, %v829_v5  ;;  %v265_v11 = vmul.f32 %v821_v2, %v821_v2  ;;  %v266_v12 = vmul.f32 %v826_v4, %v826_v4  ;;  %v855_v18 = vld [vmem:[%s812_s23 + $0x40] sm:$0xff] }
  0x13   : > { %248 = vadd.xlane.f32.xlu1 %v247_v3  ;;  %v244_v13 = vadd.f32 %v840_v9, %v837_v8  ;;  %v267_v14 = vmul.f32 %v837_v8, %v837_v8  ;;  %v268_v15 = vmul.f32 %v840_v9, %v840_v9  ;;  %v858_v19 = vld [vmem:[%s812_s23 + $0x48] sm:$0xff]  ;;  %v287_v23 = vadd.f32 %v270_v21, %v269_v20  ;;  %v867_v24 = vld [vmem:[%s812_s23 + $0x50] sm:$0xff]  ;;  %v870_v25 = vld [vmem:[%s812_s23 + $0x58] sm:$0xff] }
  0x14   : > { %242 = vadd.xlane.f32.xlu0 %v241_v7  ;;  %v281_v16 = vadd.f32 %v266_v12, %v265_v11  ;;  %v253_v22 = vadd.f32 %v858_v19, %v855_v18  ;;  %v272_v27 = vmul.f32 %v832_v6, %v832_v6  ;;  %v256_v28 = vadd.f32 %v870_v25, %v867_v24  ;;  %v879_v30 = vld [vmem:[%s812_s23 + $0x60] sm:$0xff]  ;;  %v882_v31 = vld [vmem:[%s812_s23 + $0x68] sm:$0xff]  ;;  %v891_v36 = vld [vmem:[%s812_s23 + $0x70] sm:$0xff] }
  0x15   : > { %v284_v17 = vadd.f32 %v268_v15, %v267_v14  ;;  %v273_v32 = vmul.f32 %v855_v18, %v855_v18  ;;  %v274_v33 = vmul.f32 %v858_v19, %v858_v19  ;;  %v259_v34 = vadd.f32 %v882_v31, %v879_v30  ;;  %v894_v37 = vld [vmem:[%s812_s23 + $0x78] sm:$0xff] }
  0x16   : > { %v290_v29 = vadd.f32 %v272_v27, %v271_v26  ;;  %v275_v38 = vmul.f32 %v867_v24, %v867_v24  ;;  %v276_v39 = vmul.f32 %v870_v25, %v870_v25  ;;  %v262_v40 = vadd.f32 %v894_v37, %v891_v36 }
  0x17   : > { %251 = vadd.xlane.f32.xlu1 %v250_v10  ;;  %v293_v35 = vadd.f32 %v274_v33, %v273_v32  ;;  %v279_v41 = vmul.f32 %v891_v36, %v891_v36  ;;  %v280_v42 = vmul.f32 %v894_v37, %v894_v37  ;;  %v277_v44 = vmul.f32 %v879_v30, %v879_v30 }
  0x18   : > { %245 = vadd.xlane.f32.xlu0 %v244_v13  ;;  %v296_v43 = vadd.f32 %v276_v39, %v275_v38  ;;  %v278_v45 = vmul.f32 %v882_v31, %v882_v31 }
  0x19   : > { %v302_v46 = vadd.f32 %v280_v42, %v279_v41 }
  0x1a   : > { %v299_v47 = vadd.f32 %v278_v45, %v277_v44 }
  0x1b   : > { %282 = vadd.xlane.f32.xlu1 %v281_v16 }
  0x1c   : > { %285 = vadd.xlane.f32.xlu0 %v284_v17 }
  0x1f   : > { %254 = vadd.xlane.f32.xlu1 %v253_v22 }
  0x20   : > { %288 = vadd.xlane.f32.xlu0 %v287_v23 }
  0x23   : > { %257 = vadd.xlane.f32.xlu1 %v256_v28 }
  0x24   : > { %291 = vadd.xlane.f32.xlu0 %v290_v29 }
  0x27   : > { %260 = vadd.xlane.f32.xlu1 %v259_v34 }
  0x28   : > { %294 = vadd.xlane.f32.xlu0 %v293_v35 }
  0x2b   : > { %263 = vadd.xlane.f32.xlu1 %v262_v40 }
  0x2c   : > { %297 = vadd.xlane.f32.xlu0 %v296_v43 }
  0x2f   : > { %303 = vadd.xlane.f32.xlu1 %v302_v46 }
  0x30   : > { %300 = vadd.xlane.f32.xlu0 %v299_v47 }
  0xa0   : > { %v249_v48 = vpop.xlane.xlu1 %248 }
  0xa1   : > { %v243_v49 = vpop.xlane.xlu0 %242  ;;  %v918_v60 = vmul.f32 0.00390625, %v249_v48 }
  0xa2   : > { %v910_v51 = vmul.f32 0.00390625, %v243_v49 }
  0xa3   : > { %v323_v13 = vmul.f32 %v918_v60, %v918_v60 }
  0xa4   : > { %v252_v50 = vpop.xlane.xlu1 %251  ;;  %v321_v55 = vmul.f32 %v910_v51, %v910_v51 }
  0xa5   : > { %v246_v52 = vpop.xlane.xlu0 %245  ;;  %v922_v10 = vmul.f32 0.00390625, %v252_v50 }
  0xa6   : > { %v912_v53 = vmul.f32 0.00390625, %v246_v52 }
  0xa7   : > { %v324_v17 = vmul.f32 %v922_v10, %v922_v10 }
  0xa8   : > { %v283_v54 = vpop.xlane.xlu1 %282  ;;  %v322_v58 = vmul.f32 %v912_v53, %v912_v53 }
  0xa9   : > { %v313_v56 = vmul.f32 0.00390625, %v283_v54  ;;  %v286_v57 = vpop.xlane.xlu0 %285 }
  0xaa   : > { %v314_v59 = vmul.f32 0.00390625, %v286_v57 }
  0xab   : > { %v329_v61 = vsub.f32 %v313_v56, %v321_v55 }
  0xac   : > { %v330_v62 = vsub.f32 %v314_v59, %v322_v58  ;;  %v255_v63 = vpop.xlane.xlu1 %254 }
  0xad   : > { %v920_v3 = vmax.f32 %v329_v61, 0.0  ;;  %v289_v7 = vpop.xlane.xlu0 %288  ;;  %v929_v21 = vmul.f32 0.00390625, %v255_v63 }
  0xae   : > { %v338_v11 = vmax.f32 %v330_v62, 0.0  ;;  %v315_v12 = vmul.f32 0.00390625, %v289_v7 }
  0xaf   : > { %709 = vrsqrt.f32 %v920_v3  ;;  %v325_v33 = vmul.f32 %v929_v21, %v929_v21  ;;  %vm347_vm0 = vcmp.eq.f32.partialorder %v920_v3, inf  ;;  %vm349_vm1 = vcmp.eq.f32.partialorder %v920_v3, 0.0 }
  0xb0   : > { %711 = vrsqrt.f32 %v338_v11  ;;  %v258_v14 = vpop.xlane.xlu1 %257  ;;  %v331_v15 = vsub.f32 %v315_v12, %v323_v13  ;;  %vm354_vm2 = vcmp.eq.f32.partialorder %v338_v11, inf  ;;  %v350_v59 = vand.u32 2147483648, %v920_v3 }
  0xb1   : > { %v292_v16 = vpop.xlane.xlu0 %291  ;;  %v931_v28 = vmul.f32 0.00390625, %v258_v14  ;;  %v357_v63 = vand.u32 2147483648, %v338_v11  ;;  %vm356_vm4 = vcmp.eq.f32.partialorder %v338_v11, 0.0 }
  0xb2   : > { %v316_v20 = vmul.f32 0.00390625, %v292_v16  ;;  %v339_v22 = vmax.f32 %v331_v15, 0.0 }
  0xb3   : > { %v326_v41 = vmul.f32 %v931_v28, %v931_v28 }
  0xb4   : > { %v332_v23 = vsub.f32 %v316_v20, %v324_v17  ;;  %v261_v26 = vpop.xlane.xlu1 %260  ;;  %713 = vrsqrt.f32 %v339_v22  ;;  %vm361_vm3 = vcmp.eq.f32.partialorder %v339_v22, inf  ;;  %v364_v14 = vand.u32 2147483648, %v339_v22 }
  0xb5   : > { %v295_v27 = vpop.xlane.xlu0 %294  ;;  %v942_v49 = vmul.f32 0.00390625, %v261_v26  ;;  %vm363_vm5 = vcmp.eq.f32.partialorder %v339_v22, 0.0 }
  0xb6   : > { %v340_v29 = vmax.f32 %v332_v23, 0.0  ;;  %v317_v32 = vmul.f32 0.00390625, %v295_v27 }
  0xb7   : > { %v327_v7 = vmul.f32 %v942_v49, %v942_v49 }
  0xb8   : > { %715 = vrsqrt.f32 %v340_v29  ;;  %v264_v34 = vpop.xlane.xlu1 %263  ;;  %v333_v38 = vsub.f32 %v317_v32, %v325_v33  ;;  %vm368_vm6 = vcmp.eq.f32.partialorder %v340_v29, inf  ;;  %v371_v33 = vand.u32 2147483648, %v340_v29 }
  0xb9   : > { %v710_v35 = vpop.eup %709  ;;  %v298_v39 = vpop.xlane.xlu0 %297  ;;  %v937_v42 = vmul.f32 0.00390625, %v264_v34  ;;  %vm370_vm7 = vcmp.eq.f32.partialorder %v340_v29, 0.0 }
  0xba   : > { %v712_v40 = vpop.eup %711  ;;  %v318_v43 = vmul.f32 0.00390625, %v298_v39  ;;  %v939_v44 = vmax.f32 %v333_v38, 0.0  ;;  %v346_v45 = vmul.f32 %v710_v35, %v920_v3 }
  0xbb   : > { %v353_v46 = vmul.f32 %v712_v40, %v338_v11  ;;  %v328_v52 = vmul.f32 %v937_v42, %v937_v42 }
  0xbc   : > { %v334_v47 = vsub.f32 %v318_v43, %v326_v41  ;;  %v304_v48 = vpop.xlane.xlu1 %303  ;;  %717 = vrsqrt.f32 %v939_v44  ;;  %v348_v58 = vsel %vm347_vm0, %v920_v3, %v346_v45  ;;  %v409_v3 = vld [vmem:[%s1118_s1] sm:$0xff]  ;;  %vm375_vm8 = vcmp.eq.f32.partialorder %v939_v44, inf }
  0xbd   : > { %v301_v50 = vpop.xlane.xlu0 %300  ;;  %v320_v56 = vmul.f32 0.00390625, %v304_v48  ;;  %v355_v61 = vsel %vm354_vm2, %v338_v11, %v353_v46  ;;  %v351_v16 = vsel %vm349_vm1, %v350_v59, %v348_v58  ;;  %vm377_vm9 = vcmp.eq.f32.partialorder %v939_v44, 0.0 }
  0xbe   : > { %v714_v54 = vpop.eup %713  ;;  %v949_v55 = vmax.f32 %v334_v47, 0.0  ;;  %v319_v57 = vmul.f32 0.00390625, %v301_v50  ;;  %v358_v17 = vsel %vm356_vm4, %v357_v63, %v355_v61  ;;  %v401_v35 = vadd.f32 %v351_v16, %v910_v51 }
  0xbf   : > { %v360_v62 = vmul.f32 %v714_v54, %v339_v22  ;;  %v336_v15 = vsub.f32 %v320_v56, %v328_v52  ;;  %v402_v11 = vadd.f32 %v358_v17, %v912_v53  ;;  %v411_v53 = vld [vmem:[%s1118_s1 + $0x10] sm:$0xff]  ;;  %v413_v56 = vld [vmem:[%s1118_s1 + $0x20] sm:$0xff] }
  0xc0   : > { %719 = vrsqrt.f32 %v949_v55  ;;  %v335_v23 = vsub.f32 %v319_v57, %v327_v7  ;;  %v417_v41 = vmul.f32 %v409_v3, %v401_v35  ;;  %vm382_vm11 = vcmp.eq.f32.partialorder %v949_v55, inf }
  0xc1   : > { %v362_v13 = vsel %vm361_vm3, %v339_v22, %v360_v62  ;;  %v344_v26 = vmax.f32 %v336_v15, 0.0  ;;  %v410_v22 = vld [vmem:[%s1118_s1 + $0x8] sm:$0xff]  ;;  %vm384_vm12 = vcmp.eq.f32.partialorder %v949_v55, 0.0 }
  0xc2   : > { %v716_v12 = vpop.eup %715  ;;  %v365_v27 = vsel %vm363_vm5, %v364_v14, %v362_v13  ;;  %v958_v34 = vmax.f32 %v335_v23, 0.0  ;;  %v418_v43 = vmul.f32 %v410_v22, %v402_v11 }
  0xc3   : > { %v367_v20 = vmul.f32 %v716_v12, %v340_v29  ;;  %721 = vrsqrt.f32 %v344_v26  ;;  %v403_v40 = vadd.f32 %v365_v27, %v918_v60  ;;  %v412_v60 = vld [vmem:[%s1118_s1 + $0x18] sm:$0xff]  ;;  %vm396_vm13 = vcmp.eq.f32.partialorder %v344_v26, inf }
  0xc4   : > { %723 = vrsqrt.f32 %v958_v34  ;;  %v427_v57 = vsel %vm425_vm10, %v418_v43, 0.0  ;;  %vm398_vm14 = vcmp.eq.f32.partialorder %v344_v26, 0.0  ;;  %vm389_vm15 = vcmp.eq.f32.partialorder %v958_v34, inf }
  0xc5   : > { %v369_v32 = vsel %vm368_vm6, %v340_v29, %v367_v20  ;;  %v378_v29 = vand.u32 2147483648, %v939_v44  ;;  %v419_v50 = vmul.f32 %v411_v53, %v403_v40  ;;  %vm391_vm0 = vcmp.eq.f32.partialorder %v958_v34, 0.0 }
  0xc6   : > { %v718_v38 = vpop.eup %717  ;;  %v372_v39 = vsel %vm370_vm7, %v371_v33, %v369_v32  ;;  %v392_v32 = vand.u32 2147483648, %v958_v34 }
  0xc7   : > { %v374_v51 = vmul.f32 %v718_v38, %v939_v44  ;;  %v404_v45 = vadd.f32 %v372_v39, %v922_v10  ;;  %v385_v10 = vand.u32 2147483648, %v949_v55  ;;  %v429_v63 = vsel %vm425_vm10, %v419_v50, 0.0  ;;  %v416_v38 = vld [vmem:[%s1118_s1 + $0x38] sm:$0xff] }
  0xc9   : > { %v376_v46 = vsel %vm375_vm8, %v939_v44, %v374_v51  ;;  %v426_v44 = vsel %vm425_vm10, %v417_v41, 0.0  ;;  %v420_v58 = vmul.f32 %v412_v60, %v404_v45 }
  0xca   : > { %v720_v47 = vpop.eup %719  ;;  %v379_v48 = vsel %vm377_vm9, %v378_v29, %v376_v46  ;;  %v428_v14 = vadd.f32 %v427_v57, %v426_v44 }
  0xcb   : > { %v405_v52 = vadd.f32 %v379_v48, %v929_v21  ;;  %v381_v54 = vmul.f32 %v720_v47, %v949_v55  ;;  %v414_v21 = vld [vmem:[%s1118_s1 + $0x28] sm:$0xff]  ;;  %v431_v16 = vsel %vm425_vm10, %v420_v58, 0.0  ;;  %v458_v48 = vlaneseq }
  0xcc   : > { %v430_v23 = vadd.f32 %v429_v63, %v428_v14  ;;  %v451_v58 = vld [vmem:[%s1120_s3 + $0x8] sm:$0xff] }
  0xcd   : > { %v383_v59 = vsel %vm382_vm11, %v949_v55, %v381_v54  ;;  %v722_v62 = vpop.eup %721  ;;  %v421_v7 = vmul.f32 %v413_v56, %v405_v52  ;;  %v399_v55 = vand.u32 2147483648, %v344_v26  ;;  %v459_v54 = vshrl.u32 %v458_v48, 7 }
  0xce   : > { %v386_v61 = vsel %vm384_vm12, %v385_v10, %v383_v59  ;;  %v724_v13 = vpop.eup %723  ;;  %v395_v15 = vmul.f32 %v722_v62, %v344_v26  ;;  %v432_v11 = vadd.f32 %v431_v16, %v430_v23  ;;  %v450_v59 = vld [vmem:[%s1120_s3] sm:$0xff]  ;;  %v452_v62 = vld [vmem:[%s1120_s3 + $0x10] sm:$0xff]  ;;  %v455_v16 = vld [vmem:[%s1120_s3 + $0x28] sm:$0xff] }
  0xcf   : > { %v406_v12 = vadd.f32 %v386_v61, %v931_v28  ;;  %v388_v20 = vmul.f32 %v724_v13, %v958_v34  ;;  %v433_v33 = vsel %vm425_vm10, %v421_v7, 0.0  ;;  %v460_v44 = vsub.s32 0, %v459_v54  ;;  %v453_v61 = vld [vmem:[%s1120_s3 + $0x18] sm:$0xff]  ;;  %v499_v54 = vld [vmem:[%s1121_s4 + $0x28] sm:$0xff] }
  0xd0   : > { %v397_v27 = vsel %vm396_vm13, %v344_v26, %v395_v15  ;;  %v415_v26 = vld [vmem:[%s1118_s1 + $0x30] sm:$0xff]  ;;  %v434_v51 = vadd.f32 %v433_v33, %v432_v11 }
  0xd1   : > { %v422_v17 = vmul.f32 %v414_v21, %v406_v12  ;;  %v400_v28 = vsel %vm398_vm14, %v399_v55, %v397_v27  ;;  %v390_v35 = vsel %vm389_vm15, %v958_v34, %v388_v20  ;;  %v456_v33 = vld [vmem:[%s1120_s3 + $0x30] sm:$0xff] }
  0xd2   : > { %v408_v3 = vadd.f32 %v400_v28, %v937_v42  ;;  %v393_v22 = vsel %vm391_vm0, %v392_v32, %v390_v35  ;;  %v457_v32 = vld [vmem:[%s1120_s3 + $0x38] sm:$0xff] }
  0xd3   : > { %v435_v39 = vsel %vm425_vm10, %v422_v17, 0.0  ;;  %v407_v40 = vadd.f32 %v393_v22, %v942_v49  ;;  %v447_v49 = vld [vmem:[%s1119_s2] sm:$0x1]  ;;  %v765_v22 = vmov 0  }
  0xd4   : > { %v424_v53 = vmul.f32 %v416_v38, %v408_v3  ;;  %v436_v34 = vadd.f32 %v435_v39, %v434_v51  ;;  %v454_v17 = vld [vmem:[%s1120_s3 + $0x20] sm:$0xff]  ;;  %708 = vset.pattern.permute.xlu1 %v765_v22  ;;  %707 = vset.pattern.permute.xlu0 %v765_v22  ;;  %v495_v39 = vld [vmem:[%s1121_s4 + $0x8] sm:$0xff] }
  0xd5   : > { %v423_v29 = vmul.f32 %v415_v26, %v407_v40  ;;  %v494_v40 = vld [vmem:[%s1121_s4] sm:$0xff] }
  0xd6   : > { %v439_v45 = vsel %vm425_vm10, %v424_v53, 0.0 }
  0xd7   : > { %v437_v41 = vsel %vm425_vm10, %v423_v29, 0.0 }
  0xd8   : > { %v438_v43 = vadd.f32 %v437_v41, %v436_v34  ;;  %v497_v41 = vld [vmem:[%s1121_s4 + $0x18] sm:$0xff] }
  0xda   : > { %v440_v46 = vadd.f32 %v439_v45, %v438_v43  ;;  %v496_v43 = vld [vmem:[%s1121_s4 + $0x10] sm:$0xff] }
  0xdc   : > { %v441_v42 = vrot.slane %v440_v46, 4 }
  0xde   : > { %v442_v47 = vadd.f32 %v441_v42, %v440_v46 }
  0xe0   : > { %v443_v60 = vrot.slane %v442_v47, 2 }
  0xe2   : > { %v444_v50 = vadd.f32 %v443_v60, %v442_v47 }
  0xe4   : > { %v445_v52 = vrot.slane %v444_v50, 1 }
  0xe6   : > { %v446_v56 = vadd.f32 %v445_v52, %v444_v50 }
  0xe8   : > { %v448_v10 = vadd.f32 %v447_v49, %v446_v56  ;;  %v498_v49 = vld [vmem:[%s1121_s4 + $0x20] sm:$0xff] }
  0xea   : > { %v449_v57 = vmax.f32 %v448_v10, 0.0 }
  0xec   : > { %v461_v21 = vrot.slane %v449_v57, %v460_v44 }
  0xee   : > { %v463_v63 = vmul.f32 %v461_v21, %v451_v58  ;;  %v462_v7 = vmul.f32 %v461_v21, %v450_v59  ;;  %v465_v14 = vmul.f32 %v461_v21, %v453_v61  ;;  %v464_v15 = vmul.f32 %v461_v21, %v452_v62  ;;  %v500_v62 = vld [vmem:[%s1121_s4 + $0x30] sm:$0xff] }
  0xef   : > { %v467_v23 = vmul.f32 %v461_v21, %v455_v16  ;;  %v466_v27 = vmul.f32 %v461_v21, %v454_v17  ;;  %v469_v11 = vmul.f32 %v461_v21, %v457_v32  ;;  %v468_v38 = vmul.f32 %v461_v21, %v456_v33 }
  0xf0   : > { %v473_v12 = vsel %vm425_vm10, %v463_v63, 0.0  ;;  %v470_v13 = vsel %vm425_vm10, %v462_v7, 0.0  ;;  %v479_v55 = vsel %vm425_vm10, %v465_v14, 0.0  ;;  %v476_v20 = vsel %vm425_vm10, %v464_v15, 0.0  ;;  %v501_v14 = vld [vmem:[%s1121_s4 + $0x38] sm:$0xff] }
  0xf1   : > { %474 = vadd.xlane.f32.xlu1 %v473_v12  ;;  %471 = vadd.xlane.f32.xlu0 %v470_v13  ;;  %v485_v28 = vsel %vm425_vm10, %v467_v23, 0.0  ;;  %v482_v35 = vsel %vm425_vm10, %v466_v27, 0.0  ;;  %v491_v3 = vsel %vm425_vm10, %v469_v11, 0.0  ;;  %v488_v26 = vsel %vm425_vm10, %v468_v38, 0.0 }
  0xf5   : > { %480 = vadd.xlane.f32.xlu1 %v479_v55  ;;  %477 = vadd.xlane.f32.xlu0 %v476_v20 }
  0xf9   : > { %486 = vadd.xlane.f32.xlu1 %v485_v28  ;;  %483 = vadd.xlane.f32.xlu0 %v482_v35 }
  0xfd   : > { %492 = vadd.xlane.f32.xlu1 %v491_v3  ;;  %489 = vadd.xlane.f32.xlu0 %v488_v26 }
 0x17e   : > { %v475_v51 = vpop.xlane.xlu1 %474  ;;  %v472_v53 = vpop.xlane.xlu0 %471 }
 0x17f   : > { %v503_v29 = vadd.f32 %v495_v39, %v475_v51  ;;  %v502_v34 = vadd.f32 %v494_v40, %v472_v53 }
 0x181   : > { %v511_v45 = vsub.f32 0.0, %v503_v29  ;;  %v510_v46 = vsub.f32 0.0, %v502_v34 }
 0x182   : > { %v481_v42 = vpop.xlane.xlu1 %480  ;;  %v478_v47 = vpop.xlane.xlu0 %477 }
 0x183   : > { %v520_v60 = vmul.f32 1.442695, %v511_v45  ;;  %v518_v48 = vmul.f32 1.442695, %v510_v46  ;;  %v505_v50 = vadd.f32 %v497_v41, %v481_v42  ;;  %v504_v52 = vadd.f32 %v496_v43, %v478_v47 }
 0x185   : > { %725 = vpow2.f32 %v520_v60  ;;  %v513_v56 = vsub.f32 0.0, %v505_v50  ;;  %v512_v10 = vsub.f32 0.0, %v504_v52 }
 0x186   : > { %727 = vpow2.f32 %v518_v48  ;;  %v487_v44 = vpop.xlane.xlu1 %486  ;;  %v484_v57 = vpop.xlane.xlu0 %483 }
 0x187   : > { %v524_v58 = vmul.f32 1.442695, %v513_v56  ;;  %v522_v59 = vmul.f32 1.442695, %v512_v10  ;;  %v507_v21 = vadd.f32 %v499_v54, %v487_v44  ;;  %v506_v61 = vadd.f32 %v498_v49, %v484_v57 }
 0x189   : > { %729 = vpow2.f32 %v524_v58  ;;  %v515_v63 = vsub.f32 0.0, %v507_v21  ;;  %v514_v7 = vsub.f32 0.0, %v506_v61 }
 0x18a   : > { %731 = vpow2.f32 %v522_v59  ;;  %v490_v12 = vpop.xlane.xlu0 %489  ;;  %v493_v15 = vpop.xlane.xlu1 %492 }
 0x18b   : > { %v526_v13 = vmul.f32 1.442695, %v514_v7  ;;  %v508_v16 = vadd.f32 %v500_v62, %v490_v12  ;;  %v528_v17 = vmul.f32 1.442695, %v515_v63  ;;  %v509_v55 = vadd.f32 %v501_v14, %v493_v15 }
 0x18d   : > { %733 = vpow2.f32 %v526_v13  ;;  %v516_v20 = vsub.f32 0.0, %v508_v16  ;;  %v517_v28 = vsub.f32 0.0, %v509_v55 }
 0x18e   : > { %735 = vpow2.f32 %v528_v17 }
 0x18f   : > { %v726_v23 = vpop.eup %725  ;;  %v530_v35 = vmul.f32 1.442695, %v516_v20  ;;  %v532_v26 = vmul.f32 1.442695, %v517_v28 }
 0x190   : > { %v728_v27 = vpop.eup %727  ;;  %v535_v32 = vadd.f32 1.0, %v726_v23 }
 0x191   : > { %v534_v33 = vadd.f32 1.0, %v728_v27 }
 0x192   : > { %737 = vrcp.f32 %v535_v32 }
 0x193   : > { %v730_v11 = vpop.eup %729  ;;  %739 = vrcp.f32 %v534_v33 }
 0x194   : > { %v732_v38 = vpop.eup %731  ;;  %741 = vpow2.f32 %v530_v35  ;;  %v537_v22 = vadd.f32 1.0, %v730_v11 }
 0x195   : > { %v536_v3 = vadd.f32 1.0, %v732_v38 }
 0x197   : > { %743 = vrcp.f32 %v536_v3  ;;  %v734_v39 = vpop.eup %733 }
 0x198   : > { %745 = vpow2.f32 %v532_v26  ;;  %v736_v40 = vpop.eup %735  ;;  %v538_v51 = vadd.f32 1.0, %v734_v39 }
 0x199   : > { %747 = vrcp.f32 %v537_v22  ;;  %v539_v34 = vadd.f32 1.0, %v736_v40 }
 0x19a   : > { %749 = vrcp.f32 %v538_v51 }
 0x19b   : > { %751 = vrcp.f32 %v539_v34 }
 0x19c   : > { %v738_v53 = vpop.eup %737 }
 0x19d   : > { %v740_v29 = vpop.eup %739  ;;  %565 = vperm.xlu1 %708, %v738_v53  }
 0x19e   : > { %560 = vperm.xlu0 %707, %v740_v29   ;;  %v742_v41 = vpop.eup %741 }
 0x19f   : > { %v540_v45 = vadd.f32 1.0, %v742_v41 }
 0x1a1   : > { %v744_v43 = vpop.eup %743  ;;  %753 = vrcp.f32 %v540_v45 }
 0x1a2   : > { %570 = vperm.xlu1 %708, %v744_v43   ;;  %v746_v46 = vpop.eup %745 }
 0x1a3   : > { %v748_v42 = vpop.eup %747  ;;  %v541_v47 = vadd.f32 1.0, %v746_v46 }
 0x1a4   : > { %v750_v60 = vpop.eup %749 }
 0x1a5   : > { %755 = vrcp.f32 %v541_v47  ;;  %v752_v48 = vpop.eup %751 }
 0x1a6   : > { %575 = vperm.xlu1 %708, %v748_v42  }
 0x1aa   : > { %580 = vperm.xlu1 %708, %v750_v60  }
 0x1ab   : > { %v754_v50 = vpop.eup %753 }
 0x1ae   : > { %585 = vperm.xlu1 %708, %v752_v48  }
 0x1af   : > { %v756_v52 = vpop.eup %755 }
 0x1b2   : > { %590 = vperm.xlu1 %708, %v754_v50  }
 0x1b6   : > { %595 = vperm.xlu1 %708, %v756_v52  }
 0x21c   : > { %v566_v54 = vpop.permute.xlu1 %565 }
 0x21d   : > { %v600_v49 = vmul.f32 %v566_v54, %v837_v8  ;;  %v601_v56 = vmul.f32 %v566_v54, %v840_v9  ;;  %v561_v10 = vpop.permute.xlu0 %560 }
 0x21e   : > { %v598_v44 = vmul.f32 %v561_v10, %v821_v2  ;;  %v599_v57 = vmul.f32 %v561_v10, %v826_v4 }
 0x21f   : > { %616 = vst [vmem:[%s1080_s7 + $0x10] sm:$0xff] %v600_v49  ;;  %617 = vst [vmem:[%s1080_s7 + $0x18] sm:$0xff] %v601_v56 }
 0x220   : > { %614 = vst [vmem:[%s1080_s7] sm:$0xff] %v598_v44  ;;  %615 = vst [vmem:[%s1080_s7 + $0x8] sm:$0xff] %v599_v57 }
 0x221   : > { %v571_v58 = vpop.permute.xlu1 %570 }
 0x222   : > { %v602_v59 = vmul.f32 %v571_v58, %v815_v0  ;;  %v603_v8 = vmul.f32 %v571_v58, %v818_v1 }
 0x224   : > { %618 = vst [vmem:[%s1080_s7 + $0x20] sm:$0xff] %v602_v59  ;;  %619 = vst [vmem:[%s1080_s7 + $0x28] sm:$0xff] %v603_v8 }
 0x225   : > { %v576_v9 = vpop.permute.xlu1 %575 }
 0x226   : > { %v604_v2 = vmul.f32 %v576_v9, %v829_v5  ;;  %v605_v4 = vmul.f32 %v576_v9, %v832_v6 }
 0x228   : > { %620 = vst [vmem:[%s1080_s7 + $0x30] sm:$0xff] %v604_v2  ;;  %621 = vst [vmem:[%s1080_s7 + $0x38] sm:$0xff] %v605_v4 }
 0x229   : > { %v581_v21 = vpop.permute.xlu1 %580 }
 0x22a   : > { %v606_v61 = vmul.f32 %v581_v21, %v855_v18  ;;  %v607_v0 = vmul.f32 %v581_v21, %v858_v19 }
 0x22c   : > { %622 = vst [vmem:[%s1080_s7 + $0x40] sm:$0xff] %v606_v61  ;;  %623 = vst [vmem:[%s1080_s7 + $0x48] sm:$0xff] %v607_v0 }
 0x22d   : > { %v586_v1 = vpop.permute.xlu1 %585 }
 0x22e   : > { %v608_v62 = vmul.f32 %v586_v1, %v867_v24  ;;  %v609_v5 = vmul.f32 %v586_v1, %v870_v25 }
 0x230   : > { %624 = vst [vmem:[%s1080_s7 + $0x50] sm:$0xff] %v608_v62  ;;  %625 = vst [vmem:[%s1080_s7 + $0x58] sm:$0xff] %v609_v5 }
 0x231   : > { %v591_v6 = vpop.permute.xlu1 %590 }
 0x232   : > { %v610_v63 = vmul.f32 %v591_v6, %v879_v30  ;;  %v611_v7 = vmul.f32 %v591_v6, %v882_v31 }
 0x234   : > { %626 = vst [vmem:[%s1080_s7 + $0x60] sm:$0xff] %v610_v63  ;;  %627 = vst [vmem:[%s1080_s7 + $0x68] sm:$0xff] %v611_v7 }
 0x235   : > { %v596_v18 = vpop.permute.xlu1 %595 }
 0x236   : > { %v612_v19 = vmul.f32 %v596_v18, %v891_v36  ;;  %v613_v12 = vmul.f32 %v596_v18, %v894_v37 }
 0x238   : > { %628 = vst [vmem:[%s1080_s7 + $0x70] sm:$0xff] %v612_v19  ;;  %629 = vst [vmem:[%s1080_s7 + $0x78] sm:$0xff] %v613_v12 }
 0x239 PF: > { %s15_s18 = sadd.s32 1, %s763_s18  }
 0x23a   : > { %p12_p4 = scmp.ge.s32.totalorder %s15_s18, 4  }
 0x23c   :  { %14 = sbr.rel (!%p12_p4) target bundleno = 1 (0x1), region = 70 }

</bundles_post_ra>
